<compile_context>
chip_gen: v7x
topology: tpu7x:2x2x1
jax: 0.10.0
libtpu: 0.0.40
codegen_flags: <defaults>
</compile_context>

<pallas_src>
import functools

import jax
import jax.numpy as jnp
from jax.experimental import pallas as pl
from jax.experimental.pallas import tpu as pltpu

_LANE_CANDIDATES = (2048, 1024, 512, 256, 128)   # wide, lane-dense last dims
_TARGET_BLOCK_BYTES = 4 * 1024 * 1024            # ~4 MiB per block
_MIN_BLOCK_BYTES = 512 * 1024                    # never split below ~512 KiB
_MIN_GRID_STEPS = 4                              # pipelining + v7x 2-TC split
_SMALL_FALLBACK_MAX_ELEMS = 1 << 16              # odd sizes below this: 1 block
_VMEM_LIMIT_BYTES = 32 * 1024 * 1024             # explicit, v7x-safe


def _satlu_kernel(x_ref, o_ref, *, lo, hi):
    # max-then-min clamp: 2 VPU ops/element, fully hidden under the HBM DMA.
    o_ref[...] = jnp.minimum(jnp.maximum(x_ref[...], lo), hi)


def _round_up(x, m):
    return ((x + m - 1) // m) * m


def _round_down(x, m):
    return (x // m) * m


def _pick_lane_width(total):
    for w in _LANE_CANDIDATES:
        if total % w == 0:
            return w
    return None


def _cost(total, itemsize):
    # 2 VALU ops/element; read + write of the whole tensor.
    return pl.CostEstimate(flops=2 * total, transcendentals=0,
                           bytes_accessed=2 * total * itemsize)


def _satlu_single_block(x2d, lo, hi):
    """Small array as one full-extent block — no grid, no padding, 1x traffic."""
    return pl.pallas_call(
        functools.partial(_satlu_kernel, lo=lo, hi=hi),
        out_shape=jax.ShapeDtypeStruct(x2d.shape, x2d.dtype),
        compiler_params=pltpu.CompilerParams(
            vmem_limit_bytes=_VMEM_LIMIT_BYTES),
        cost_estimate=_cost(x2d.size, x2d.dtype.itemsize),
    )(x2d)


def _satlu_2d(x2d, lo, hi, donate_input):
    """Gridded, lane-dense path for (rows, w) with w a multiple of 128."""
    rows, w = x2d.shape
    elem = x2d.dtype.itemsize
    row_bytes = w * elem
    sub = max(8, 32 // elem)          # packed sublane multiple: 8 / 16 / 32

    # Rows per ~4 MiB block, rounded to the packed sublane multiple.
    tile_rows = max(sub, _round_down(_TARGET_BLOCK_BYTES // row_bytes, sub))
    steps = pl.cdiv(rows, tile_rows)
    if steps < _MIN_GRID_STEPS:
        # Split into up to 4 blocks so in/out DMAs pipeline across steps and
        # both v7x TensorCores stream — but keep each block >= ~512 KiB and
        # >= one packed sublane tile of rows.
        min_rows = max(sub, _round_up(pl.cdiv(_MIN_BLOCK_BYTES, row_bytes), sub))
        feasible = max(1, rows // min_rows)
        steps = min(_MIN_GRID_STEPS, feasible)
        if 1 < steps < _MIN_GRID_STEPS and steps % 2 == 1:
            steps -= 1                # even split balances v7x's two TCs
        tile_rows = max(min_rows, _round_up(pl.cdiv(rows, steps), sub))
    tile_rows = min(tile_rows, rows)  # full-extent block if it would exceed
    grid = (pl.cdiv(rows, tile_rows),)   # partial last block masked by Pallas

    return pl.pallas_call(
        functools.partial(_satlu_kernel, lo=lo, hi=hi),
        out_shape=jax.ShapeDtypeStruct((rows, w), x2d.dtype),
        grid_spec=pltpu.PrefetchScalarGridSpec(
            num_scalar_prefetch=0,
            grid=grid,
            in_specs=[pl.BlockSpec((tile_rows, w), lambda i: (i, 0))],
            out_specs=pl.BlockSpec((tile_rows, w), lambda i: (i, 0)),
        ),
        compiler_params=pltpu.CompilerParams(
            # TODO(synk): on v7x, sweep pltpu.CORE_PARALLEL and
            # pipeline_mode=pl.Buffered(3); kept portable "parallel" here.
            dimension_semantics=("parallel",),
            vmem_limit_bytes=_VMEM_LIMIT_BYTES,
        ),
        cost_estimate=_cost(rows * w, elem),
        input_output_aliases={0: 0} if donate_input else {},
    )(x2d)


def satlu(x, lower=0.0, upper=255.0, *, donate_input=False):
    """SatLU: clamp(x, lower, upper) == F.hardtanh(x, lower, upper).

    Works elementwise on any shape (the PyTorch module uses NCHW). Set
    donate_input=True (and donate the buffer at the jit level) to alias the
    output onto the input HBM buffer for very large tensors.

    Note: bounds are cast to x.dtype; for low-precision / integer dtypes a
    non-representable bound shifts the thresholds — fine for the f32 default.
    """
    orig_shape = x.shape
    dtype = x.dtype
    total = x.size
    if total == 0:
        return x

    # Hoisted, dtype-typed clamp constants -> lowered as immediates/splats.
    lo = jnp.dtype(dtype).type(lower)
    hi = jnp.dtype(dtype).type(upper)

    x_flat = jnp.ravel(x)             # free bitcast for a contiguous input
    w = _pick_lane_width(total)

    if w is not None:
        # Common path: zero extra HBM passes, lane-dense blocks.
        out2d = _satlu_2d(x_flat.reshape(total // w, w), lo, hi, donate_input)
        return out2d.reshape(orig_shape)

    if total <= _SMALL_FALLBACK_MAX_ELEMS:
        # Small tensor whose size is not a multiple of 128: one full-extent
        # (1, N) block — no pad, no slice, no extra HBM traffic; Mosaic masks
        # the partial lane tile.
        out2d = _satlu_single_block(x_flat.reshape(1, total), lo, hi)
        return out2d.reshape(orig_shape)

    # Rare: large tensor whose element count is not a multiple of 128.
    # TODO(synk): a 1-D gridded BlockSpec with a masked partial last block
    # would remove the pad + slice HBM passes; kept the simple path for safety.
    w = 1024
    padded = _round_up(total, w)
    x_pad = jnp.pad(x_flat, (0, padded - total))
    out2d = _satlu_2d(x_pad.reshape(padded // w, w), lo, hi, False)
    return out2d.reshape(-1)[:total].reshape(orig_shape)


if __name__ == "__main__":
    key = jax.random.PRNGKey(0)
    lower, upper = 0.0, 255.0

    # 1) NCHW input (module's typical use), values spanning below 0 / above 255.
    x = jax.random.normal(key, (2, 4, 16, 16), dtype=jnp.float32) * 200.0
    y = jax.block_until_ready(satlu(x, lower, upper))
    assert y.shape == x.shape and y.dtype == x.dtype
    assert jnp.allclose(y, jnp.clip(x, lower, upper)), "mismatch (main path)"

    # 2) Medium NCHW input: exercises the multi-step (pipelined) grid.
    x_med = jax.random.normal(jax.random.PRNGKey(2), (2, 8, 128, 128),
                              dtype=jnp.float32) * 300.0
    y_med = jax.block_until_ready(satlu(x_med, lower, upper))
    assert jnp.allclose(y_med, jnp.clip(x_med, lower, upper)), "mismatch (grid path)"

    # 3) bf16 input: exercises the packed-sublane (16-row) tiling.
    x_bf = (jax.random.normal(jax.random.PRNGKey(3), (2, 8, 128, 128),
                              dtype=jnp.float32) * 300.0).astype(jnp.bfloat16)
    y_bf = jax.block_until_ready(satlu(x_bf, lower, upper))
    assert y_bf.dtype == jnp.bfloat16
    assert jnp.allclose(y_bf, jnp.clip(x_bf, lower, upper)), "mismatch (bf16 path)"

    # 4) Odd-sized input: exercises the pad-free single-block fallback.
    x_odd = jax.random.normal(jax.random.PRNGKey(1), (3, 5, 7), jnp.float32) * 400.0
    y_odd = jax.block_until_ready(satlu(x_odd, lower, upper))
    assert y_odd.shape == x_odd.shape and y_odd.dtype == x_odd.dtype
    assert jnp.allclose(y_odd, jnp.clip(x_odd, lower, upper)), "mismatch (odd path)"

    print("KERNEL_OK")
</pallas_src>

<mosaic_0001>
module attributes {stable_mosaic.version = 11 : i64} {
  func.func @_satlu_kernel(%arg0: i32, %arg1: memref<1x2048xf32, #tpu.memory_space<vmem>>, %arg2: memref<1x2048xf32, #tpu.memory_space<vmem>>) attributes {dimension_semantics = [#tpu.dimension_semantics<parallel>], iteration_bounds = array<i64: 1>, scalar_prefetch = 0 : i64, scratch_operands = 0 : i64, tpu.core_type = #tpu.core_type<tc>, window_params = [{transform_indices = @transform_0, window_bounds = array<i64: 1, 2048>}, {transform_indices = @transform_1, window_bounds = array<i64: 1, 2048>}]} {
    %c0 = arith.constant 0 : index
    %c0_0 = arith.constant 0 : index
    %0 = vector.load %arg1[%c0, %c0_0] : memref<1x2048xf32, #tpu.memory_space<vmem>>, vector<1x2048xf32>
    %cst = arith.constant 0.000000e+00 : f32
    %1 = vector.broadcast %cst : f32 to vector<1x2048xf32>
    %2 = arith.maximumf %0, %1 : vector<1x2048xf32>
    %cst_1 = arith.constant 2.550000e+02 : f32
    %3 = vector.broadcast %cst_1 : f32 to vector<1x2048xf32>
    %4 = arith.minimumf %2, %3 : vector<1x2048xf32>
    %c0_2 = arith.constant 0 : index
    %c0_3 = arith.constant 0 : index
    %5 = vector.load %arg2[%c0_2, %c0_3] : memref<1x2048xf32, #tpu.memory_space<vmem>>, vector<1x2048xf32>
    tpu.vector_store %arg2[%c0_2, %c0_3], %4 {strides = array<i32>} : memref<1x2048xf32, #tpu.memory_space<vmem>>, vector<1x2048xf32>,
    return
  }
  func.func @transform_0(%arg0: i32) -> (i32, i32) {
    %c0_i32 = arith.constant 0 : i32
    %c0_i32_0 = arith.constant 0 : i32
    return %arg0, %c0_i32 : i32, i32
  }
  func.func @transform_1(%arg0: i32) -> (i32, i32) {
    %c0_i32 = arith.constant 0 : i32
    %c0_i32_0 = arith.constant 0 : i32
    return %arg0, %c0_i32 : i32, i32
  }
}

</mosaic_0001>

<bundles_post_ra>
// kernel: tpu_custom_call.1
= control target key start
LH: loop header
LB: loop body
LE: loop exit
PB: predicated region body
PF: predicated region fallthrough
CT: control target
= control target key end

     0   :  { %6 = vsyncpa [#allocation3], 0  ;;  %s130_s0 = inlined_call_operand.hbm [shape: f32[1,2048], index: 0, kind: input, shape index: {}]   ;;  %s131_s1 = inlined_call_operand.hbm [shape: f32[1,2048], index: 1, kind: output, shape index: {}]  }
   0x1   :  { %7 = vsyncpa [#allocation4], 0  ;;  %s94_s6 = smov [#allocation2]   ;;  %s46_s10 = scalar_lea.hbm %s130_s0, 256 }
   0x2   :  { %s14_s7 = sshll.u32 %s94_s6, 4  ;;  %p47_p0 = scmp.ne.s32.totalorder %s130_s0, %s46_s10  ;;  %s15_s7 = int_to_ptr.vmem [resolvable:$true] %s14_s7 }
   0x3   :  { %p50_p1 = scmp.lt.u32.totalorder %s46_s10, %s130_s0 }
   0x5   :  { %p52_p2 = pnand %p50_p1, %p47_p0 }
   0x7   :  { %55 = shalt.err (!%p52_p2)
}
   0x8   :  { %s56_s15 = scalar_lea.vmem %s15_s7, 256  ;;  %p61_p4 = scmp.lt.s32.totalorder %s15_s7, %s15_s7 }
   0x9   :  { %p57_p3 = scmp.ne.s32.totalorder %s15_s7, %s56_s15  ;;  %p62_p5 = scmp.lt.s32.totalorder %s56_s15, %s56_s15 }
   0xb   :  { %p63_p6 = por %p62_p5, %p61_p4 }
   0xd   :  { %p64_p7 = pnand %p63_p6, %p57_p3 }
   0xf   :  { %67 = shalt.err (!%p64_p7)
}
  0x10   :  { %17 = dma.hbm_to_vmem [thread:$0]  %s130_s0, 256, %s15_s7, [#allocation3]  }
  0x11   :  { %90 = dma.done.wait [#allocation3], 256  }
  0x12   :  { %91 = vsyncadd [#allocation3], 4294967040  ;;  %v21_v0 = vld [vmem:[#allocation2] sm:$0xff]  ;;  %v22_v1 = vld [vmem:[#allocation2 + $0x8] sm:$0xff]  ;;  %s95_s18 = smov [#allocation5]  }
  0x13   :  { %s35_s19 = sshll.u32 %s95_s18, 4  ;;  %v23_v2 = vmax.f32 %v21_v0, 0.0  ;;  %v24_v3 = vmax.f32 %v22_v1, 0.0  ;;  %s36_s19 = int_to_ptr.vmem [resolvable:$true] %s35_s19 }
  0x14   :  { %s68_s20 = scalar_lea.vmem %s36_s19, 256  ;;  %p73_p9 = scmp.lt.s32.totalorder %s36_s19, %s36_s19 }
  0x15   :  { %v25_v4 = vmin.f32 %v23_v2, 255.0  ;;  %v26_v5 = vmin.f32 %v24_v3, 255.0  ;;  %p69_p8 = scmp.ne.s32.totalorder %s36_s19, %s68_s20  ;;  %p74_p10 = scmp.lt.s32.totalorder %s68_s20, %s68_s20 }
  0x17   :  { %27 = vst [vmem:[#allocation5] sm:$0xff] %v25_v4  ;;  %28 = vst [vmem:[#allocation5 + $0x8] sm:$0xff] %v26_v5  ;;  %p75_p11 = por %p74_p10, %p73_p9 }
  0x19   :  { %p76_p12 = pnand %p75_p11, %p69_p8 }
  0x1b   :  { %79 = shalt.err (!%p76_p12)
}
  0x1c   :  { %s80_s22 = scalar_lea.hbm %s131_s1, 256 }
  0x1d   :  { %p81_p13 = scmp.ne.s32.totalorder %s131_s1, %s80_s22  ;;  %p84_p0 = scmp.lt.u32.totalorder %s80_s22, %s131_s1 }
  0x1f   :  { %p86_p1 = pnand %p84_p0, %p81_p13 }
  0x21   :  { %89 = shalt.err (!%p86_p1)
}
  0x22   :  { %38 = dma.vmem_to_hbm [thread:$0]  %s36_s19, 256, %s131_s1, [#allocation4]  }
  0x23   :  { %92 = dma.done.wait [#allocation4], 256  }
  0x24   :  { %93 = vsyncadd [#allocation4], 4294967040 }
  0x25   :  { %42 = vsyncpa [#allocation3], 1 }
  0x26   :  { %43 = vsyncpa [#allocation4], 1 }

</bundles_post_ra>
